<compile_context>
chip_gen: v7x
topology: tpu7x:2x2x1
jax: 0.10.0
libtpu: 0.0.40
codegen_flags: <defaults>
</compile_context>

<pallas_src>
import jax
import jax.numpy as jnp
from jax.experimental import pallas as pl
from jax.experimental.pallas import tpu as pltpu

NEG_SLOPE = 0.01  # F.leaky_relu default negative_slope


def policy_net_kernel(x_ref, w1_ref, b1_ref, w2_ref, b2_ref, w3_ref, b3_ref, o_ref):
    x = x_ref[...]  # (TM, in_dim), f32 or bf16

    # fc1 + leaky_relu (accumulate in f32, bias add / activation in f32)
    h1 = jnp.dot(x, w1_ref[...], preferred_element_type=jnp.float32) + b1_ref[...]
    h1 = jnp.where(h1 > 0, h1, NEG_SLOPE * h1)

    # fc2 + leaky_relu
    h2 = jnp.dot(h1.astype(w2_ref.dtype), w2_ref[...],
                 preferred_element_type=jnp.float32) + b2_ref[...]
    h2 = jnp.where(h2 > 0, h2, NEG_SLOPE * h2)

    # fc3 + softmax(dim=-1)
    logits = jnp.dot(h2.astype(w3_ref.dtype), w3_ref[...],
                     preferred_element_type=jnp.float32) + b3_ref[...]
    m = jnp.max(logits, axis=-1, keepdims=True)
    e = jnp.exp(logits - m)
    d = jnp.sum(e, axis=-1, keepdims=True)
    # EUP approximate reciprocal + one Newton step (~f32 accuracy, keeps the
    # divide off the VALU).
    inv = pl.reciprocal(d, approx=True)
    inv = inv * (2.0 - d * inv)
    o_ref[...] = e * inv


def _round_up(n, m):
    return ((n + m - 1) // m) * m


def policy_net_forward(x, params, *, block_rows=2048, compute_dtype=jnp.float32):
    """x: (B, ...) flattened to (B, input_dim) like PyTorch's reshape(B, -1).

    block_rows: batch tile size (>=2048 recommended on v6e/v7x to amortize the
    ~0.35 us/step grid overhead; any multiple of 8 works).
    compute_dtype: dtype fed to the MXU for x and the weights (f32 or bf16);
    accumulation, bias adds, activations and softmax stay f32.
    """
    batch = x.shape[0]
    x2d = x.reshape(batch, -1)
    w1, b1, w2, b2, w3, b3 = params
    in_dim = x2d.shape[-1]
    hid1 = w1.shape[1]
    hid2 = w2.shape[1]
    out_dim = w3.shape[1]

    x2d = x2d.astype(compute_dtype)
    w1c, w2c, w3c = (w.astype(compute_dtype) for w in (w1, w2, w3))
    b1f, b2f, b3f = (b.astype(jnp.float32).reshape(1, -1) for b in (b1, b2, b3))

    # Batch tiling: pad to a multiple of the tile so the last tile is full.
    tm = _round_up(min(block_rows, _round_up(batch, 8)), 8)
    padded = _round_up(batch, tm)
    if padded != batch:
        x2d = jnp.pad(x2d, ((0, padded - batch), (0, 0)))
    grid = (padded // tm,)

    cost = pl.CostEstimate(
        flops=2 * padded * (in_dim * hid1 + hid1 * hid2 + hid2 * out_dim),
        transcendentals=padded * out_dim,
        bytes_accessed=int(
            x2d.size * x2d.dtype.itemsize
            + padded * out_dim * 4
            + sum(a.size * a.dtype.itemsize
                  for a in (w1c, w2c, w3c, b1f, b2f, b3f))
        ),
    )

    out = pl.pallas_call(
        policy_net_kernel,
        out_shape=jax.ShapeDtypeStruct((padded, out_dim), jnp.float32),
        grid=grid,
        in_specs=[
            # x: tiled over the batch, double-buffered by the Pallas pipeline.
            pl.BlockSpec((tm, in_dim), lambda i: (i, 0)),
            # weights/biases: constant block index -> one DMA, VMEM-resident.
            pl.BlockSpec((in_dim, hid1), lambda i: (0, 0)),
            pl.BlockSpec((1, hid1), lambda i: (0, 0)),
            pl.BlockSpec((hid1, hid2), lambda i: (0, 0)),
            pl.BlockSpec((1, hid2), lambda i: (0, 0)),
            pl.BlockSpec((hid2, out_dim), lambda i: (0, 0)),
            pl.BlockSpec((1, out_dim), lambda i: (0, 0)),
        ],
        out_specs=pl.BlockSpec((tm, out_dim), lambda i: (i, 0)),
        compiler_params=pltpu.CompilerParams(
            dimension_semantics=("parallel",),       # megacore on v7x
            vmem_limit_bytes=32 * 1024 * 1024,        # explicit, fits all gens
        ),
        cost_estimate=cost,
    )(x2d, w1c, b1f, w2c, b2f, w3c, b3f)

    return out[:batch]


def init_params(key, input_dim, output_dim, hidden=32):
    """PyTorch-style uniform(+-1/sqrt(fan_in)) init; weights stored transposed
    as (in_features, out_features)."""
    ks = jax.random.split(key, 6)

    def lin(kw, kb, fan_in, fan_out):
        bound = 1.0 / jnp.sqrt(float(fan_in))
        w = jax.random.uniform(kw, (fan_in, fan_out), jnp.float32, -bound, bound)
        b = jax.random.uniform(kb, (1, fan_out), jnp.float32, -bound, bound)
        return w, b

    w1, b1 = lin(ks[0], ks[1], input_dim, hidden)
    w2, b2 = lin(ks[2], ks[3], hidden, hidden)
    w3, b3 = lin(ks[4], ks[5], hidden, output_dim)
    return (w1, b1, w2, b2, w3, b3)


def policy_net_ref(x, params, compute_dtype=jnp.float32):
    """Pure-JAX reference (mirrors the kernel's cast points)."""
    batch = x.shape[0]
    x2d = x.reshape(batch, -1).astype(compute_dtype)
    w1, b1, w2, b2, w3, b3 = params
    w1, w2, w3 = (w.astype(compute_dtype) for w in (w1, w2, w3))
    b1, b2, b3 = (b.astype(jnp.float32) for b in (b1, b2, b3))
    h1 = jnp.dot(x2d, w1, preferred_element_type=jnp.float32) + b1
    h1 = jnp.where(h1 > 0, h1, NEG_SLOPE * h1)
    h2 = jnp.dot(h1.astype(compute_dtype), w2, preferred_element_type=jnp.float32) + b2
    h2 = jnp.where(h2 > 0, h2, NEG_SLOPE * h2)
    logits = jnp.dot(h2.astype(compute_dtype), w3, preferred_element_type=jnp.float32) + b3
    return jax.nn.softmax(logits, axis=-1)


if __name__ == "__main__":
    key = jax.random.PRNGKey(0)
    k_x, k_p, k_x2 = jax.random.split(key, 3)

    input_dim, output_dim, hidden = 16, 4, 32
    params = init_params(k_p, input_dim, output_dim, hidden)

    # Small case matching the module: observations (batch, 4, 4) -> flatten to 16.
    x_small = jax.random.normal(k_x, (2, 4, 4), dtype=jnp.float32)
    out = jax.block_until_ready(policy_net_forward(x_small, params))
    ref = policy_net_ref(x_small, params)
    assert out.shape == (2, output_dim)
    assert jnp.allclose(out, ref, atol=1e-5, rtol=1e-5)
    assert jnp.allclose(jnp.sum(out, axis=-1), 1.0, atol=1e-5)

    # Multi-tile + ragged batch: exercises the grid, padding and weight residency.
    x_big = jax.random.normal(k_x2, (300, 4, 4), dtype=jnp.float32)
    out_big = jax.block_until_ready(
        policy_net_forward(x_big, params, block_rows=128))
    ref_big = policy_net_ref(x_big, params)
    assert out_big.shape == (300, output_dim)
    assert jnp.allclose(out_big, ref_big, atol=1e-5, rtol=1e-5)
    assert jnp.allclose(jnp.sum(out_big, axis=-1), 1.0, atol=1e-5)

    # bf16 input/weight path (f32 accumulation) per review; looser tolerance.
    out_bf16 = jax.block_until_ready(
        policy_net_forward(x_big, params, block_rows=128,
                           compute_dtype=jnp.bfloat16))
    ref_bf16 = policy_net_ref(x_big, params, compute_dtype=jnp.bfloat16)
    assert jnp.allclose(out_bf16, ref_bf16, atol=1e-4, rtol=1e-4)
    assert jnp.allclose(jnp.sum(out_bf16, axis=-1), 1.0, atol=1e-4)

    print("KERNEL_OK")
</pallas_src>

<mosaic_0001>
module attributes {stable_mosaic.version = 11 : i64} {
  func.func @policy_net_kernel(%arg0: i32, %arg1: memref<8x16xf32, #tpu.memory_space<vmem>>, %arg2: memref<16x32xf32, #tpu.memory_space<vmem>>, %arg3: memref<1x32xf32, #tpu.memory_space<vmem>>, %arg4: memref<32x32xf32, #tpu.memory_space<vmem>>, %arg5: memref<1x32xf32, #tpu.memory_space<vmem>>, %arg6: memref<32x4xf32, #tpu.memory_space<vmem>>, %arg7: memref<1x4xf32, #tpu.memory_space<vmem>>, %arg8: memref<8x4xf32, #tpu.memory_space<vmem>>) attributes {dimension_semantics = [#tpu.dimension_semantics<parallel>], iteration_bounds = array<i64: 1>, scalar_prefetch = 0 : i64, scratch_operands = 0 : i64, tpu.core_type = #tpu.core_type<tc>, window_params = [{transform_indices = @transform_0, window_bounds = array<i64: 8, 16>}, {pipeline_mode = #tpu.pipeline_mode<synchronous>, transform_indices = @transform_1, window_bounds = array<i64: 16, 32>}, {pipeline_mode = #tpu.pipeline_mode<synchronous>, transform_indices = @transform_2, window_bounds = array<i64: 1, 32>}, {pipeline_mode = #tpu.pipeline_mode<synchronous>, transform_indices = @transform_3, window_bounds = array<i64: 32, 32>}, {pipeline_mode = #tpu.pipeline_mode<synchronous>, transform_indices = @transform_4, window_bounds = array<i64: 1, 32>}, {pipeline_mode = #tpu.pipeline_mode<synchronous>, transform_indices = @transform_5, window_bounds = array<i64: 32, 4>}, {pipeline_mode = #tpu.pipeline_mode<synchronous>, transform_indices = @transform_6, window_bounds = array<i64: 1, 4>}, {transform_indices = @transform_7, window_bounds = array<i64: 8, 4>}]} {
    %c0 = arith.constant 0 : index
    %c0_0 = arith.constant 0 : index
    %0 = vector.load %arg1[%c0, %c0_0] : memref<8x16xf32, #tpu.memory_space<vmem>>, vector<8x16xf32>
    %c0_1 = arith.constant 0 : index
    %c0_2 = arith.constant 0 : index
    %1 = vector.load %arg2[%c0_1, %c0_2] : memref<16x32xf32, #tpu.memory_space<vmem>>, vector<16x32xf32>
    %cst = arith.constant dense<0.000000e+00> : vector<8x32xf32>
    %2 = tpu.matmul %0, %1, %cst {dimension_numbers = #tpu.dot_dimension_numbers<[1], [0], [0], [1], [0, 0, 1, 1], [], []>} : vector<8x16xf32>, vector<16x32xf32>, vector<8x32xf32> -> vector<8x32xf32>
    %c0_3 = arith.constant 0 : index
    %c0_4 = arith.constant 0 : index
    %3 = vector.load %arg3[%c0_3, %c0_4] : memref<1x32xf32, #tpu.memory_space<vmem>>, vector<1x32xf32>
    %4 = vector.broadcast %3 : vector<1x32xf32> to vector<8x32xf32>
    %5 = arith.addf %2, %4 : vector<8x32xf32>
    %cst_5 = arith.constant 0.000000e+00 : f32
    %6 = vector.broadcast %cst_5 : f32 to vector<8x32xf32>
    %7 = arith.cmpf ogt, %5, %6 : vector<8x32xf32>
    %cst_6 = arith.constant 0.00999999977 : f32
    %8 = vector.broadcast %cst_6 : f32 to vector<8x32xf32>
    %9 = arith.mulf %8, %5 : vector<8x32xf32>
    %10 = arith.select %7, %5, %9 : vector<8x32xi1>, vector<8x32xf32>
    %c0_7 = arith.constant 0 : index
    %c0_8 = arith.constant 0 : index
    %11 = vector.load %arg4[%c0_7, %c0_8] : memref<32x32xf32, #tpu.memory_space<vmem>>, vector<32x32xf32>
    %cst_9 = arith.constant dense<0.000000e+00> : vector<8x32xf32>
    %12 = tpu.matmul %10, %11, %cst_9 {dimension_numbers = #tpu.dot_dimension_numbers<[1], [0], [0], [1], [0, 0, 1, 1], [], []>} : vector<8x32xf32>, vector<32x32xf32>, vector<8x32xf32> -> vector<8x32xf32>
    %c0_10 = arith.constant 0 : index
    %c0_11 = arith.constant 0 : index
    %13 = vector.load %arg5[%c0_10, %c0_11] : memref<1x32xf32, #tpu.memory_space<vmem>>, vector<1x32xf32>
    %14 = vector.broadcast %13 : vector<1x32xf32> to vector<8x32xf32>
    %15 = arith.addf %12, %14 : vector<8x32xf32>
    %cst_12 = arith.constant 0.000000e+00 : f32
    %16 = vector.broadcast %cst_12 : f32 to vector<8x32xf32>
    %17 = arith.cmpf ogt, %15, %16 : vector<8x32xf32>
    %cst_13 = arith.constant 0.00999999977 : f32
    %18 = vector.broadcast %cst_13 : f32 to vector<8x32xf32>
    %19 = arith.mulf %18, %15 : vector<8x32xf32>
    %20 = arith.select %17, %15, %19 : vector<8x32xi1>, vector<8x32xf32>
    %c0_14 = arith.constant 0 : index
    %c0_15 = arith.constant 0 : index
    %21 = vector.load %arg6[%c0_14, %c0_15] : memref<32x4xf32, #tpu.memory_space<vmem>>, vector<32x4xf32>
    %cst_16 = arith.constant dense<0.000000e+00> : vector<8x4xf32>
    %22 = tpu.matmul %20, %21, %cst_16 {dimension_numbers = #tpu.dot_dimension_numbers<[1], [0], [0], [1], [0, 0, 1, 1], [], []>} : vector<8x32xf32>, vector<32x4xf32>, vector<8x4xf32> -> vector<8x4xf32>
    %c0_17 = arith.constant 0 : index
    %c0_18 = arith.constant 0 : index
    %23 = vector.load %arg7[%c0_17, %c0_18] : memref<1x4xf32, #tpu.memory_space<vmem>>, vector<1x4xf32>
    %24 = vector.broadcast %23 : vector<1x4xf32> to vector<8x4xf32>
    %25 = arith.addf %22, %24 : vector<8x4xf32>
    %cst_19 = arith.constant dense<0xFF800000> : vector<8xf32>
    %26 = vector.multi_reduction <maximumf>, %25, %cst_19 [1] : vector<8x4xf32> to vector<8xf32>
    %27 = vector.shape_cast %26 : vector<8xf32> to vector<8x1xf32>
    %28 = vector.broadcast %27 : vector<8x1xf32> to vector<8x4xf32>
    %29 = arith.subf %25, %28 : vector<8x4xf32>
    %30 = math.exp %29 : vector<8x4xf32>
    %cst_20 = arith.constant dense<0.000000e+00> : vector<8xf32>
    %31 = vector.multi_reduction <add>, %30, %cst_20 [1] : vector<8x4xf32> to vector<8xf32>
    %32 = vector.shape_cast %31 : vector<8xf32> to vector<8x1xf32>
    %33 = tpu.reciprocal %32 {approx = true} : vector<8x1xf32> -> vector<8x1xf32>
    %34 = arith.mulf %32, %33 : vector<8x1xf32>
    %cst_21 = arith.constant 2.000000e+00 : f32
    %35 = vector.broadcast %cst_21 : f32 to vector<8x1xf32>
    %36 = arith.subf %35, %34 : vector<8x1xf32>
    %37 = arith.mulf %33, %36 : vector<8x1xf32>
    %38 = vector.broadcast %37 : vector<8x1xf32> to vector<8x4xf32>
    %39 = arith.mulf %30, %38 : vector<8x4xf32>
    %c0_22 = arith.constant 0 : index
    %c0_23 = arith.constant 0 : index
    %40 = vector.load %arg8[%c0_22, %c0_23] : memref<8x4xf32, #tpu.memory_space<vmem>>, vector<8x4xf32>
    tpu.vector_store %arg8[%c0_22, %c0_23], %39 {strides = array<i32>} : memref<8x4xf32, #tpu.memory_space<vmem>>, vector<8x4xf32>,
    return
  }
  func.func @transform_0(%arg0: i32) -> (i32, i32) {
    %c0_i32 = arith.constant 0 : i32
    %c0_i32_0 = arith.constant 0 : i32
    return %arg0, %c0_i32 : i32, i32
  }
  func.func @transform_1(%arg0: i32) -> (i32, i32) {
    %c0_i32 = arith.constant 0 : i32
    %c0_i32_0 = arith.constant 0 : i32
    %c0_i32_1 = arith.constant 0 : i32
    return %c0_i32, %c0_i32_0 : i32, i32
  }
  func.func @transform_2(%arg0: i32) -> (i32, i32) {
    %c0_i32 = arith.constant 0 : i32
    %c0_i32_0 = arith.constant 0 : i32
    %c0_i32_1 = arith.constant 0 : i32
    return %c0_i32, %c0_i32_0 : i32, i32
  }
  func.func @transform_3(%arg0: i32) -> (i32, i32) {
    %c0_i32 = arith.constant 0 : i32
    %c0_i32_0 = arith.constant 0 : i32
    %c0_i32_1 = arith.constant 0 : i32
    return %c0_i32, %c0_i32_0 : i32, i32
  }
  func.func @transform_4(%arg0: i32) -> (i32, i32) {
    %c0_i32 = arith.constant 0 : i32
    %c0_i32_0 = arith.constant 0 : i32
    %c0_i32_1 = arith.constant 0 : i32
    return %c0_i32, %c0_i32_0 : i32, i32
  }
  func.func @transform_5(%arg0: i32) -> (i32, i32) {
    %c0_i32 = arith.constant 0 : i32
    %c0_i32_0 = arith.constant 0 : i32
    %c0_i32_1 = arith.constant 0 : i32
    return %c0_i32, %c0_i32_0 : i32, i32
  }
  func.func @transform_6(%arg0: i32) -> (i32, i32) {
    %c0_i32 = arith.constant 0 : i32
    %c0_i32_0 = arith.constant 0 : i32
    %c0_i32_1 = arith.constant 0 : i32
    return %c0_i32, %c0_i32_0 : i32, i32
  }
  func.func @transform_7(%arg0: i32) -> (i32, i32) {
    %c0_i32 = arith.constant 0 : i32
    %c0_i32_0 = arith.constant 0 : i32
    return %arg0, %c0_i32 : i32, i32
  }
}

</mosaic_0001>

<bundles_post_ra>
// kernel: tpu_custom_call.1
= control target key start
LH: loop header
LB: loop body
LE: loop exit
PB: predicated region body
PF: predicated region fallthrough
CT: control target
= control target key end

     0   :  { %12 = vsyncpa [#allocation3], 0  ;;  %s417_s24 = smov [#allocation2]   ;;  %s520_s0 = inlined_call_operand.vmem [shape: f32[8,16], index: 0, kind: input, shape index: {}]   ;;  %s521_s1 = inlined_call_operand.hbm [shape: f32[16,32], index: 1, kind: input, shape index: {}]   ;;  %s522_s2 = inlined_call_operand.vmem [shape: f32[1,32], index: 2, kind: input, shape index: {}]   ;;  %s523_s3 = inlined_call_operand.vmem [shape: f32[32,32], index: 3, kind: input, shape index: {}]   ;;  %s524_s4 = inlined_call_operand.vmem [shape: f32[1,32], index: 4, kind: input, shape index: {}]   ;;  %s525_s5 = inlined_call_operand.vmem [shape: f32[32,4], index: 5, kind: input, shape index: {}]   ;;  %s526_s6 = inlined_call_operand.vmem [shape: f32[1,4], index: 6, kind: input, shape index: {}]   ;;  %s527_s7 = inlined_call_operand.vmem [shape: f32[8,4], index: 7, kind: output, shape index: {}]  }
   0x1   :  { %s20_s25 = sshll.u32 %s417_s24, 4  ;;  %s393_s28 = scalar_lea.hbm %s521_s1, 256  ;;  %s21_s25 = int_to_ptr.vmem [resolvable:$true] %s20_s25 }
   0x2   :  { %p394_p0 = scmp.ne.s32.totalorder %s521_s1, %s393_s28  ;;  %p397_p1 = scmp.lt.u32.totalorder %s393_s28, %s521_s1 }
   0x4   :  { %p399_p2 = pnand %p397_p1, %p394_p0 }
   0x6   :  { %402 = shalt.err (!%p399_p2)
}
   0x7   :  { %s403_s10 = scalar_lea.vmem %s21_s25, 256  ;;  %p408_p4 = scmp.lt.s32.totalorder %s21_s25, %s21_s25 }
   0x8   :  { %p404_p3 = scmp.ne.s32.totalorder %s21_s25, %s403_s10  ;;  %p409_p5 = scmp.lt.s32.totalorder %s403_s10, %s403_s10 }
   0xa   :  { %p410_p6 = por %p409_p5, %p408_p4 }
   0xc   :  { %p411_p7 = pnand %p410_p6, %p404_p3 }
   0xe   :  { %414 = shalt.err (!%p411_p7)
}
   0xf   :  { %s418_s11 = smov 128   ;;  %s419_s12 = smov 8  }
  0x10   :  { %26 = dma.hbm_to_vmem [thread:$0]  %s521_s1, 256, %s21_s25, [#allocation3], %s418_s11, %s418_s11, %s419_s12  }
  0x11   :  { %415 = dma.done.wait [#allocation3], 256  }
  0x12   :  { %416 = vsyncadd [#allocation3], 4294967040  ;;  %v420_v0 = vmov 0.0|0.0   ;;  %vm421_vm0 = vmmov 0   ;;  %v422_v1 = vmov 0.0   ;;  %v41_v2 = vld [vmem:[#allocation2] sm:$0xff] }
  0x13   :  { %368 = vmatprep.subr.bf16.mxu0 %v420_v0  ;;  %343 = vmatprep.mubr.msk.f32.mxu0 %vm421_vm0, %v422_v1  ;;  %v42_v3 = vld [vmem:[#allocation2 + $0x8] sm:$0xff]  ;;  %v127_v5 = vld [vmem:[%s523_s3] sm:$0xff]  ;;  %vm50_vm1 = vcmask 130048   ;;  %v129_v9 = vld [vmem:[%s523_s3 + $0x10] sm:$0xff]  ;;  %vm138_vm3 = vcmask 261120   ;;  %vm299_vm5 = vcmask 31744  }
  0x14   :  { %371 = vmatprep.subr.bf16.mxu1 %v420_v0  ;;  %354 = vmatprep.mubr.msk.f32.mxu1 %vm421_vm0, %v422_v1  ;;  %v369_v4 = vpack.c.bf16 %v42_v3, %v41_v2  ;;  %v128_v6 = vld [vmem:[%s523_s3 + $0x8] sm:$0xff]  ;;  %v40_v8 = vld [vmem:[%s520_s0] sm:$0xff]  ;;  %v130_v10 = vld [vmem:[%s523_s3 + $0x18] sm:$0xff] }
  0x15   :  { %v372_v7 = vpack.c.bf16 %v128_v6, %v127_v5  ;;  %v375_v11 = vpack.c.bf16 %v130_v10, %v129_v9  ;;  %v215_v12 = vld [vmem:[%s525_s5] sm:$0xff]  ;;  %v216_v13 = vld [vmem:[%s525_s5 + $0x8] sm:$0xff]  ;;  %v217_v21 = vld [vmem:[%s525_s5 + $0x10] sm:$0xff] }
  0x16   :  { %370 = vmatpush3.bf16.msra.mxu0 %v369_v4  ;;  %v378_v14 = vpack.c.bf16 %v216_v13, %v215_v12  ;;  %v320_v15 = vld [vmem:[%s522_s2] ss:$0 sm:$0xff]  ;;  %v218_v22 = vld [vmem:[%s525_s5 + $0x18] sm:$0xff] }
  0x17   :  { %373 = vmatpush3.bf16.msra.mxu1 %v372_v7  ;;  %377 = vmatprep.subr.bf16.mxu0 %v420_v0  ;;  %v381_v23 = vpack.c.bf16 %v218_v22, %v217_v21  ;;  %v322_v24 = vld [vmem:[%s524_s4] ss:$0 sm:$0xff] }
  0x18   :  { %374 = vmatprep.subr.bf16.mxu1 %v420_v0  ;;  %v324_v30 = vld [vmem:[%s526_s6] ss:$0 sm:$0xff] }
  0x19   :  { %344 = vmatmul.mubr.msk.f32.vlgmr.msra.gmra.mrb[0].mxu0 %vm50_vm1, %v40_v8 }
  0x1a   :  { %365 = vmatprep.mubr.msk.f32.mxu0 %vm421_vm0, %v422_v1  ;;  %379 = vmatpush3.bf16.msra.mxu0 %v378_v14 }
  0x1b   :  { %376 = vmatpush3.bf16.msra.mxu1 %v375_v11  ;;  %380 = vmatprep.subr.bf16.mxu0 %v420_v0 }
  0x1e   :  { %382 = vmatpush3.bf16.msra.mxu0 %v381_v23 }
  0xec   :  { %v120_v16 = vpop.f32.mrb[0].mxu0 }
  0xed   :  { %v121_v17 = vadd.f32 %v320_v15, %v120_v16  ;;  %v345_v18 = vpop.f32.mrb[1].mxu0 }
  0xef   :  { %vm124_vm2 = vcmp.gt.f32.partialorder %v121_v17, 0.0  ;;  %v125_v19 = vmul.f32 0.01, %v121_v17 }
  0xf1   :  { %v126_v20 = vsel %vm124_vm2, %v121_v17, %v125_v19 }
  0xf2   :  { %355 = vmatmul.mubr.msk.f32.vlgmr.msra.gmra.mrb[0].mxu1 %vm138_vm3, %v126_v20 }
 0x1c5   :  { %v208_v25 = vpop.f32.mrb[0].mxu1 }
 0x1c6   :  { %v209_v26 = vadd.f32 %v322_v24, %v208_v25  ;;  %v356_v27 = vpop.f32.mrb[1].mxu1 }
 0x1c8   :  { %vm212_vm4 = vcmp.gt.f32.partialorder %v209_v26, 0.0  ;;  %v213_v28 = vmul.f32 0.01, %v209_v26 }
 0x1ca   :  { %v214_v29 = vsel %vm212_vm4, %v209_v26, %v213_v28 }
 0x1cb   :  { %366 = vmatmul.mubr.msk.f32.vlgmr.msra.gmra.mrb[2].mxu0 %vm138_vm3, %v214_v29 }
 0x29e   :  { %v295_v31 = vpop.f32.mrb[2].mxu0 }
 0x29f   :  { %v296_v32 = vadd.f32 %v324_v30, %v295_v31  ;;  %v367_v33 = vpop.f32.mrb[3].mxu0 }
 0x2a1   :  { %v300_v34 = vsel %vm299_vm5, %v296_v32, -inf }
 0x2a2   :  { %301 = vmax.xlane.f32.xlu0 %v300_v34 }
 0x32f   :  { %v302_v35 = vpop.xlane.xlu0 %301 }
 0x330   :  { %v303_v36 = vsub.f32 %v296_v32, %v302_v35 }
 0x332   :  { %v304_v37 = vmul.f32 1.442695, %v303_v36 }
 0x334   :  { %389 = vpow2.f32 %v304_v37 }
 0x33e   :  { %v390_v38 = vpop.eup %389 }
 0x33f   :  { %v306_v39 = vsel %vm299_vm5, %v390_v38, 0.0 }
 0x340   :  { %307 = vadd.xlane.f32.xlu0 %v306_v39 }
 0x3cd   :  { %v308_v40 = vpop.xlane.xlu0 %307 }
 0x3ce   :  { %391 = vrcp.f32 %v308_v40 }
 0x3d8   :  { %v392_v41 = vpop.eup %391 }
 0x3d9   :  { %v310_v42 = vmul.f32 %v392_v41, %v308_v40 }
 0x3db   :  { %v311_v43 = vsub.f32 2.0, %v310_v42 }
 0x3dd   :  { %v312_v44 = vmul.f32 %v392_v41, %v311_v43 }
 0x3df   :  { %v313_v45 = vmul.f32 %v390_v38, %v312_v44 }
 0x3e1   :  { %314 = vst.msk [vmem:[%s527_s7] sm:$0xff] %vm299_vm5, %v313_v45 }
 0x3e2   :  { %319 = vsyncpa [#allocation3], 1 }

</bundles_post_ra>
